<compile_context>
chip_gen: v7x
topology: tpu7x:2x2x1
jax: 0.10.0
libtpu: 0.0.40
codegen_flags: <defaults>
</compile_context>

<pallas_src>
import jax
import jax.numpy as jnp
from jax.experimental import pallas as pl
from jax.experimental.pallas import tpu as pltpu

EPS = 1e-5  # nn.LayerNorm default


def _round_up(n, m):
    return ((n + m - 1) // m) * m


def _vmem_cap_bytes():
    """85% of the chip's physical VMEM; conservative 64 MiB (v7x) fallback."""
    try:
        cap = int(pltpu.get_tpu_info().vmem_capacity_bytes)
    except Exception:
        cap = 64 << 20
    return int(cap * 0.85)


def _layernorm_affine(out_f32, g_ref, be_ref):
    # One-pass stats (E[x], E[x^2]); biased variance like torch.nn.LayerNorm.
    mean = jnp.mean(out_f32, axis=-1, keepdims=True)
    mean_sq = jnp.mean(out_f32 * out_f32, axis=-1, keepdims=True)
    var = jnp.maximum(mean_sq - mean * mean, 0.0)
    inv = jax.lax.rsqrt(var + EPS)
    normed = (out_f32 - mean) * inv
    return normed * g_ref[...].astype(jnp.float32) + be_ref[...].astype(jnp.float32)


def _fused_kernel(x_ref, w_ref, b_ref, g_ref, be_ref, o_ref):
    """Resident-weight path: 1-D grid over row tiles."""
    x = x_ref[...]                                           # (TR, D) native dtype
    lhs = x if x.dtype == w_ref.dtype else x.astype(w_ref.dtype)
    sub = jnp.dot(lhs, w_ref[...], preferred_element_type=jnp.float32)
    out = sub + b_ref[...].astype(jnp.float32) + x.astype(jnp.float32)
    o_ref[...] = _layernorm_affine(out, g_ref, be_ref).astype(o_ref.dtype)


def _fused_ktiled_kernel(x_ref, w_ref, b_ref, g_ref, be_ref, o_ref, acc_ref):
    """Streamed-weight path: grid = (row tiles, k tiles); f32 accumulator."""
    k = pl.program_id(1)
    tk = w_ref.shape[0]

    @pl.when(k == 0)
    def _():
        acc_ref[...] = jnp.zeros_like(acc_ref)

    off = pl.multiple_of(k * tk, 128)
    x_chunk = x_ref[:, pl.ds(off, tk)]                       # sliced from VMEM
    lhs = x_chunk if x_chunk.dtype == w_ref.dtype else x_chunk.astype(w_ref.dtype)
    acc_ref[...] += jnp.dot(lhs, w_ref[...], preferred_element_type=jnp.float32)

    @pl.when(k == pl.num_programs(1) - 1)
    def _():
        out = (acc_ref[...] + b_ref[...].astype(jnp.float32)
               + x_ref[...].astype(jnp.float32))
        o_ref[...] = _layernorm_affine(out, g_ref, be_ref).astype(o_ref.dtype)


def residual_connection_layer(x, w, b, gamma, beta, *,
                              row_tile=None, k_tile=None, bf16_matmul=None):
    """x: [B, S, D]; w: [D, D]; b, gamma, beta: [D]."""
    B, S, D = x.shape
    R = B * S
    assert w.shape == (D, D)

    # bf16 MXU operands when inputs are f32 and the matmul is big enough to be
    # compute-bound; f32 accumulation / residual / LayerNorm kept either way.
    if bf16_matmul is None:
        bf16_matmul = (x.dtype == jnp.float32 and w.dtype == jnp.float32 and D >= 512)
    w_mat = w.astype(jnp.bfloat16) if bf16_matmul else w

    x_it = jnp.dtype(x.dtype).itemsize
    w_it = jnp.dtype(w_mat.dtype).itemsize
    o_it = x_it
    cap = _vmem_cap_bytes()

    # --- row tile ------------------------------------------------------------
    if row_tile is None:
        row_tile = 512 if D <= 2048 else 256
    tile = max(8, min(_round_up(int(row_tile), 8), _round_up(R, 8)))
    # Megacore: keep >= 2 row-tile grid steps when R allows so both TCs work.
    if tile >= R and R > 8:
        tile = _round_up((R + 1) // 2, 8)

    # --- VMEM budgets (true buffer counts + f32 intermediates) ---------------
    def path_a_bytes(t):
        return (D * D * w_it              # resident weight, single-buffered
                + 2 * t * D * x_it        # x tile, double-buffered
                + 2 * t * D * o_it        # out tile, double-buffered
                + 3 * 8 * D * 4           # bias / gamma / beta (sublane-padded)
                + 4 * t * D * 4           # f32 intermediates (dot, out, normed)
                + (2 << 20))              # headroom

    def path_b_bytes(t, tk):
        return (2 * tk * D * w_it         # streamed weight, double-buffered
                + 2 * t * D * x_it        # x tile (constant over k) buffers
                + 2 * t * D * o_it
                + t * D * 4               # f32 accumulator scratch
                + 3 * 8 * D * 4
                + 4 * t * D * 4
                + (2 << 20))

    # --- path selection -------------------------------------------------------
    use_ktile = k_tile is not None
    if not use_ktile:
        while path_a_bytes(tile) > cap and tile > 64:
            tile = max(64, _round_up(tile // 2, 8))
        use_ktile = path_a_bytes(tile) > cap   # resident weight does not fit

    tk = None
    if use_ktile:
        cands = [t for t in range(128, min(D, 1024) + 1, 128) if D % t == 0]
        if k_tile is not None and int(k_tile) in cands:
            tk = int(k_tile)
        elif cands:
            tk = cands[-1]
        else:
            use_ktile = False  # D not a multiple of 128: cannot K-tile cleanly
    if use_ktile:
        while path_b_bytes(tile, tk) > cap and tile > 64:
            tile = max(64, _round_up(tile // 2, 8))
        if path_b_bytes(tile, tk) > cap:
            tk = cands[0]
    # TODO(synk): huge D that is not a multiple of 128 can still exceed VMEM on
    # the resident-weight path; Mosaic will reject that extreme configuration.

    x2 = x.reshape(R, D)           # no padding: cdiv grid + masked partial store
    b2 = b.reshape(1, D)
    g2 = gamma.reshape(1, D)
    be2 = beta.reshape(1, D)

    resident = pl.Buffered(1)      # constant-index operands: single VMEM buffer

    if not use_ktile:
        grid = (pl.cdiv(R, tile),)
        footprint = path_a_bytes(tile)
        in_specs = [
            pl.BlockSpec((tile, D), lambda i: (i, 0)),                              # x (streamed)
            pl.BlockSpec((D, D), lambda i: (0, 0), pipeline_mode=resident),         # weight (resident)
            pl.BlockSpec((1, D), lambda i: (0, 0), pipeline_mode=resident),         # bias
            pl.BlockSpec((1, D), lambda i: (0, 0), pipeline_mode=resident),         # gamma
            pl.BlockSpec((1, D), lambda i: (0, 0), pipeline_mode=resident),         # beta
        ]
        out_spec = pl.BlockSpec((tile, D), lambda i: (i, 0))
        kernel = _fused_kernel
        scratch = []
        dims = ("parallel",)
    else:
        grid = (pl.cdiv(R, tile), D // tk)
        footprint = path_b_bytes(tile, tk)
        in_specs = [
            pl.BlockSpec((tile, D), lambda i, k: (i, 0)),                           # x rows (const over k)
            pl.BlockSpec((tk, D), lambda i, k: (k, 0)),                             # weight K-chunks (streamed)
            pl.BlockSpec((1, D), lambda i, k: (0, 0), pipeline_mode=resident),      # bias
            pl.BlockSpec((1, D), lambda i, k: (0, 0), pipeline_mode=resident),      # gamma
            pl.BlockSpec((1, D), lambda i, k: (0, 0), pipeline_mode=resident),      # beta
        ]
        out_spec = pl.BlockSpec((tile, D), lambda i, k: (i, 0))
        kernel = _fused_ktiled_kernel
        scratch = [pltpu.VMEM((tile, D), jnp.float32)]
        dims = ("parallel", "arbitrary")

    vmem_limit = int(min(cap, max(footprint, 32 << 20)))

    out2 = pl.pallas_call(
        kernel,
        out_shape=jax.ShapeDtypeStruct((R, D), x.dtype),
        grid=grid,
        in_specs=in_specs,
        out_specs=out_spec,
        scratch_shapes=scratch,
        compiler_params=pltpu.CompilerParams(
            dimension_semantics=dims,
            vmem_limit_bytes=vmem_limit,
        ),
    )(x2, w_mat, b2, g2, be2)

    return out2.reshape(B, S, D)


def _reference(x, w, b, gamma, beta, *, matmul_dtype=None):
    xm = x if matmul_dtype is None else x.astype(matmul_dtype).astype(jnp.float32)
    wm = w if matmul_dtype is None else w.astype(matmul_dtype).astype(jnp.float32)
    sub = jnp.einsum("bsd,de->bse", xm, wm,
                     preferred_element_type=jnp.float32) + b
    out = sub + x
    mean = jnp.mean(out, axis=-1, keepdims=True)
    var = jnp.mean((out - mean) ** 2, axis=-1, keepdims=True)
    normed = (out - mean) * jax.lax.rsqrt(var + EPS)
    return (normed * gamma + beta).astype(x.dtype)


def _make_inputs(B, S, D, key):
    kx, kw, kb, kg, kbe = jax.random.split(key, 5)
    x = jax.random.normal(kx, (B, S, D), dtype=jnp.float32)
    w = jax.random.normal(kw, (D, D), dtype=jnp.float32) * (1.0 / jnp.sqrt(D))
    b = 0.02 * jax.random.normal(kb, (D,), dtype=jnp.float32)
    gamma = 1.0 + 0.05 * jax.random.normal(kg, (D,), dtype=jnp.float32)
    beta = 0.05 * jax.random.normal(kbe, (D,), dtype=jnp.float32)
    return x, w, b, gamma, beta


if __name__ == "__main__":
    # 1) Default fused path (resident weight), f32 matmul.
    x, w, b, g, be = _make_inputs(2, 8, 128, jax.random.PRNGKey(0))
    out = jax.block_until_ready(residual_connection_layer(x, w, b, g, be))
    assert out.shape == x.shape
    assert jnp.allclose(out, _reference(x, w, b, g, be), atol=1e-4, rtol=1e-4), \
        "mismatch vs reference (resident-weight path)"

    # 2) K-tiled path (streamed weight, accumulator + epilogue), forced small tk.
    x2, w2, b2, g2, be2 = _make_inputs(2, 8, 256, jax.random.PRNGKey(1))
    out2 = jax.block_until_ready(
        residual_connection_layer(x2, w2, b2, g2, be2, k_tile=128))
    assert jnp.allclose(out2, _reference(x2, w2, b2, g2, be2),
                        atol=1e-3, rtol=1e-3), "mismatch vs reference (K-tiled path)"

    # 3) Partial last row-block (R not a multiple of the tile; masked stores).
    x3, w3, b3, g3, be3 = _make_inputs(3, 5, 128, jax.random.PRNGKey(2))
    out3 = jax.block_until_ready(residual_connection_layer(x3, w3, b3, g3, be3))
    assert jnp.allclose(out3, _reference(x3, w3, b3, g3, be3),
                        atol=1e-4, rtol=1e-4), "mismatch vs reference (partial block)"

    # 4) bf16 MXU operands (f32 accumulation), compared against a bf16-consistent ref.
    out4 = jax.block_until_ready(
        residual_connection_layer(x, w, b, g, be, bf16_matmul=True))
    assert jnp.allclose(out4, _reference(x, w, b, g, be, matmul_dtype=jnp.bfloat16),
                        atol=1e-2, rtol=1e-2), "mismatch vs reference (bf16 matmul)"

    print("KERNEL_OK")
</pallas_src>

<mosaic_0001>
module attributes {stable_mosaic.version = 11 : i64} {
  func.func @_fused_kernel(%arg0: i32, %arg1: memref<8x128xf32, #tpu.memory_space<vmem>>, %arg2: memref<128x128xf32, #tpu.memory_space<vmem>>, %arg3: memref<1x128xf32, #tpu.memory_space<vmem>>, %arg4: memref<1x128xf32, #tpu.memory_space<vmem>>, %arg5: memref<1x128xf32, #tpu.memory_space<vmem>>, %arg6: memref<8x128xf32, #tpu.memory_space<vmem>>) attributes {dimension_semantics = [#tpu.dimension_semantics<parallel>], iteration_bounds = array<i64: 2>, scalar_prefetch = 0 : i64, scratch_operands = 0 : i64, tpu.core_type = #tpu.core_type<tc>, window_params = [{transform_indices = @transform_0, window_bounds = array<i64: 8, 128>}, {pipeline_mode = #tpu.pipeline_mode<synchronous>, transform_indices = @transform_1, window_bounds = array<i64: 128, 128>}, {pipeline_mode = #tpu.pipeline_mode<synchronous>, transform_indices = @transform_2, window_bounds = array<i64: 1, 128>}, {pipeline_mode = #tpu.pipeline_mode<synchronous>, transform_indices = @transform_3, window_bounds = array<i64: 1, 128>}, {pipeline_mode = #tpu.pipeline_mode<synchronous>, transform_indices = @transform_4, window_bounds = array<i64: 1, 128>}, {transform_indices = @transform_5, window_bounds = array<i64: 8, 128>}]} {
    %c0 = arith.constant 0 : index
    %c0_0 = arith.constant 0 : index
    %0 = vector.load %arg1[%c0, %c0_0] : memref<8x128xf32, #tpu.memory_space<vmem>>, vector<8x128xf32>
    %c0_1 = arith.constant 0 : index
    %c0_2 = arith.constant 0 : index
    %1 = vector.load %arg2[%c0_1, %c0_2] : memref<128x128xf32, #tpu.memory_space<vmem>>, vector<128x128xf32>
    %cst = arith.constant dense<0.000000e+00> : vector<8x128xf32>
    %2 = tpu.matmul %0, %1, %cst {dimension_numbers = #tpu.dot_dimension_numbers<[1], [0], [0], [1], [0, 0, 1, 1], [], []>} : vector<8x128xf32>, vector<128x128xf32>, vector<8x128xf32> -> vector<8x128xf32>
    %c0_3 = arith.constant 0 : index
    %c0_4 = arith.constant 0 : index
    %3 = vector.load %arg3[%c0_3, %c0_4] : memref<1x128xf32, #tpu.memory_space<vmem>>, vector<1x128xf32>
    %4 = vector.broadcast %3 : vector<1x128xf32> to vector<8x128xf32>
    %5 = arith.addf %2, %4 : vector<8x128xf32>
    %6 = arith.addf %5, %0 : vector<8x128xf32>
    %cst_5 = arith.constant dense<0.000000e+00> : vector<8xf32>
    %7 = vector.multi_reduction <add>, %6, %cst_5 [1] : vector<8x128xf32> to vector<8xf32>
    %8 = vector.shape_cast %7 : vector<8xf32> to vector<8x1xf32>
    %cst_6 = arith.constant 1.280000e+02 : f32
    %9 = vector.broadcast %cst_6 : f32 to vector<8x1xf32>
    %10 = arith.divf %8, %9 : vector<8x1xf32>
    %11 = arith.mulf %6, %6 : vector<8x128xf32>
    %cst_7 = arith.constant dense<0.000000e+00> : vector<8xf32>
    %12 = vector.multi_reduction <add>, %11, %cst_7 [1] : vector<8x128xf32> to vector<8xf32>
    %13 = vector.shape_cast %12 : vector<8xf32> to vector<8x1xf32>
    %cst_8 = arith.constant 1.280000e+02 : f32
    %14 = vector.broadcast %cst_8 : f32 to vector<8x1xf32>
    %15 = arith.divf %13, %14 : vector<8x1xf32>
    %16 = arith.mulf %10, %10 : vector<8x1xf32>
    %17 = arith.subf %15, %16 : vector<8x1xf32>
    %cst_9 = arith.constant 0.000000e+00 : f32
    %18 = vector.broadcast %cst_9 : f32 to vector<8x1xf32>
    %19 = arith.maximumf %17, %18 : vector<8x1xf32>
    %cst_10 = arith.constant 9.99999974E-6 : f32
    %20 = vector.broadcast %cst_10 : f32 to vector<8x1xf32>
    %21 = arith.addf %19, %20 : vector<8x1xf32>
    %22 = math.rsqrt %21 : vector<8x1xf32>
    %23 = vector.broadcast %10 : vector<8x1xf32> to vector<8x128xf32>
    %24 = arith.subf %6, %23 : vector<8x128xf32>
    %25 = vector.broadcast %22 : vector<8x1xf32> to vector<8x128xf32>
    %26 = arith.mulf %24, %25 : vector<8x128xf32>
    %c0_11 = arith.constant 0 : index
    %c0_12 = arith.constant 0 : index
    %27 = vector.load %arg4[%c0_11, %c0_12] : memref<1x128xf32, #tpu.memory_space<vmem>>, vector<1x128xf32>
    %28 = vector.broadcast %27 : vector<1x128xf32> to vector<8x128xf32>
    %29 = arith.mulf %26, %28 : vector<8x128xf32>
    %c0_13 = arith.constant 0 : index
    %c0_14 = arith.constant 0 : index
    %30 = vector.load %arg5[%c0_13, %c0_14] : memref<1x128xf32, #tpu.memory_space<vmem>>, vector<1x128xf32>
    %31 = vector.broadcast %30 : vector<1x128xf32> to vector<8x128xf32>
    %32 = arith.addf %29, %31 : vector<8x128xf32>
    %c0_15 = arith.constant 0 : index
    %c0_16 = arith.constant 0 : index
    %33 = vector.load %arg6[%c0_15, %c0_16] : memref<8x128xf32, #tpu.memory_space<vmem>>, vector<8x128xf32>
    tpu.vector_store %arg6[%c0_15, %c0_16], %32 {strides = array<i32>} : memref<8x128xf32, #tpu.memory_space<vmem>>, vector<8x128xf32>,
    return
  }
  func.func @transform_0(%arg0: i32) -> (i32, i32) {
    %c0_i32 = arith.constant 0 : i32
    %c0_i32_0 = arith.constant 0 : i32
    return %arg0, %c0_i32 : i32, i32
  }
  func.func @transform_1(%arg0: i32) -> (i32, i32) {
    %c0_i32 = arith.constant 0 : i32
    %c0_i32_0 = arith.constant 0 : i32
    %c0_i32_1 = arith.constant 0 : i32
    return %c0_i32, %c0_i32_0 : i32, i32
  }
  func.func @transform_2(%arg0: i32) -> (i32, i32) {
    %c0_i32 = arith.constant 0 : i32
    %c0_i32_0 = arith.constant 0 : i32
    %c0_i32_1 = arith.constant 0 : i32
    return %c0_i32, %c0_i32_0 : i32, i32
  }
  func.func @transform_3(%arg0: i32) -> (i32, i32) {
    %c0_i32 = arith.constant 0 : i32
    %c0_i32_0 = arith.constant 0 : i32
    %c0_i32_1 = arith.constant 0 : i32
    return %c0_i32, %c0_i32_0 : i32, i32
  }
  func.func @transform_4(%arg0: i32) -> (i32, i32) {
    %c0_i32 = arith.constant 0 : i32
    %c0_i32_0 = arith.constant 0 : i32
    %c0_i32_1 = arith.constant 0 : i32
    return %c0_i32, %c0_i32_0 : i32, i32
  }
  func.func @transform_5(%arg0: i32) -> (i32, i32) {
    %c0_i32 = arith.constant 0 : i32
    %c0_i32_0 = arith.constant 0 : i32
    return %arg0, %c0_i32 : i32, i32
  }
}

</mosaic_0001>

<bundles_post_ra>
// kernel: tpu_custom_call.1
= control target key start
LH: loop header
LB: loop body
LE: loop exit
PB: predicated region body
PF: predicated region fallthrough
CT: control target
= control target key end

     0   :  { %10 = vsyncpa [#allocation3], 0  ;;  %s1013_s0 = inlined_call_operand.hbm [shape: f32[16,128], index: 0, kind: input, shape index: {}]   ;;  %s1014_s1 = inlined_call_operand.hbm [shape: f32[128,128], index: 1, kind: input, shape index: {}]   ;;  %s1015_s2 = inlined_call_operand.vmem [shape: f32[1,128], index: 2, kind: input, shape index: {}]   ;;  %s1016_s3 = inlined_call_operand.vmem [shape: f32[1,128], index: 3, kind: input, shape index: {}]   ;;  %s1017_s4 = inlined_call_operand.vmem [shape: f32[1,128], index: 4, kind: input, shape index: {}]   ;;  %s1018_s5 = inlined_call_operand.hbm [shape: f32[16,128], index: 5, kind: output, shape index: {}]  }
   0x1   :  { %12 = vsyncpa [#allocation3 + $0x1], 0 }
   0x2   :  { %13 = vsyncpa [#allocation6], 0 }
   0x3   :  { %14 = vsyncpa [#allocation4], 0 }
   0x4   :  { %16 = vsyncpa [#allocation4 + $0x1], 0  ;;  %s801_s18 = smov 0   ;;  %s803_s19 = smov 0  }
   0x5   :  { %s805_s20 = smov 0   ;;  %s807_s21 = smov 0  }
   0x6 LB: > { %s822_s22 = sadd.s32 4294967295, %s761_s21   ;;  %s476_s23 = sadd.s32 4294967294, %s761_s21   ;;  %s761_s21 = sphi %s807_s21, %s1038_s21   ;;  %s757_s20 = sphi %s805_s20, %s1037_s20   ;;  %s753_s19 = sphi %s803_s19, %s1036_s19   ;;  %s749_s18 = sphi %s801_s18, %s1035_s18  }
   0x7   : > { %p42_p0 = scmp.ne.s32.totalorder %s753_s19, %s749_s18  ;;  %p1019_p1 = scmp.eq.s32.totalorder %s822_s22, 0 }
   0x8   : > { %p156_p3 = scmp.eq.s32.totalorder %s476_s23, 1  ;;  %p477_p5 = scmp.ge.s32.totalorder %s761_s21, 1 }
   0x9   : > { %p831_p4 = por %p1019_p1, %p42_p0  ;;  %p163_p7 = scmp.lt.s32.totalorder %s761_s21, 3 }
   0xa   : > { %p836_p6 = por %p156_p3, %p42_p0  ;;  %s763_s27 = smov [#allocation5]  }
   0xb   : > { %s1022_s24 = scalar_select %p831_p4, 1, 0 }
   0xc   : > { %s1023_s25 = scalar_select %p836_p6, 1, 0 }
   0xd   : > { %p841_p8 = pnand %p477_p5, %p163_p7  ;;  %s175_s28 = sshll.u32 %s763_s27, 4  ;;  %s845_s28 = int_to_ptr.vmem [resolvable:$true] %s175_s28 }
   0xe   : > { %s857_s30 = sadd.s32 1, %s761_s21   ;;  %s29_s6 = sadd.s32 1, %s757_s20 }
   0xf   : > { %s1024_s26 = scalar_select %p841_p8, 1, 0 }
  0x10   : > { %p577_p9 = pneg %p841_p8  ;;  %s26_s7 = ssub.s32 %s761_s21, %s857_s30 }
  0x11   : > { %s633_s10 = scalar_lea.hbm %s1014_s1, 2048 }
  0x12   : > { %p852_p11 = pnand %p577_p9, %p1019_p1  ;;  %p634_p12 = scmp.ne.s32.totalorder %s1014_s1, %s633_s10 }
  0x13   : > { %p640_p5 = scmp.lt.u32.totalorder %s633_s10, %s1014_s1 }
  0x14   : > { %p635_p13 = pneg %p852_p11 }
  0x16   : > { %p636_p0 = pnand %p635_p13, %p634_p12 }
  0x18   : > { %p637_p3 = pneg %p636_p0 }
  0x1a   : > { %p642_p7 = pnand %p640_p5, %p637_p3 }
  0x1c   : > { %645 = shalt.err (!%p642_p7)
}
  0x1d   : > { %s646_s15 = scalar_lea.vmem %s845_s28, 2048  ;;  %p654_p2 = scmp.lt.s32.totalorder %s845_s28, %s845_s28 }
  0x1e   : > { %p647_p9 = scmp.ne.s32.totalorder %s845_s28, %s646_s15  ;;  %p655_p6 = scmp.lt.s32.totalorder %s646_s15, %s646_s15 }
  0x20   : > { %p649_p10 = pnand %p647_p9, %p635_p13  ;;  %p656_p4 = por %p655_p6, %p654_p2 }
  0x22   : > { %p650_p1 = pneg %p649_p10 }
  0x24   : > { %p657_p8 = pnand %p656_p4, %p650_p1 }
  0x26   : > { %660 = shalt.err (!%p657_p8)
}
  0x27   : > { %s764_s16 = smov 128   ;;  %s765_s17 = smov 8  }
  0x28   : > { %580 = dma.hbm_to_vmem [thread:$0]  (!%p852_p11), %s1014_s1, 2048, %s845_s28, [#allocation6], %s764_s16, %s764_s16, %s765_s17  }
  0x29   : > { %p27_p2 = scmp.eq.s32.totalorder %s26_s7, 0  ;;  %p36_p1 = scmp.ne.s32.totalorder %s757_s20, %s753_s19 }
  0x2a   : > { %p37_p4 = scmp.eq.s32.totalorder %s761_s21, 0  ;;  %p590_p6 = scmp.lt.s32.totalorder %s761_s21, 2 }
  0x2b   : > { %s888_s8 = scalar_select %p27_p2, %s757_s20, %s29_s6  }
  0x2c   : > { %p38_p8 = por %p37_p4, %p36_p1  ;;  %p1026_p10 = scmp.eq.s32.totalorder %s822_s22, 1 }
  0x2d   : > { %s198_s10 = sand.u32 1, %s757_s20   ;;  %s481_s11 = sshll.u32 %s761_s21, 7 }
  0x2e   : > { %p892_p12 = por %p1026_p10, %p36_p1  ;;  %s480_s12 = sshll.u32 %s198_s10, 3 }
  0x2f   : > { %s901_s14 = scalar_lea.hbm %s1013_s0, %s481_s11  ;;  %s202_s28 = scalar_lea.vmem [#allocation2], %s480_s12 }
  0x30   : > { %s209_s6 = sshll.u32 %s202_s28, 4  ;;  %p903_p11 = pnand %p590_p6, %p38_p8  ;;  %s907_s6 = int_to_ptr.vmem [resolvable:$true] %s209_s6 }
  0x31   : > { %s199_s15 = scalar_lea.sflag [#allocation3], %s198_s10  ;;  %s661_s16 = scalar_lea.hbm %s901_s14, 128 }
  0x32   : > { %p662_p13 = scmp.ne.s32.totalorder %s901_s14, %s661_s16  ;;  %p663_p0 = pneg %p903_p11 }
  0x33   : > { %s666_s27 = scalar_lea.hbm %s1013_s0, 256  ;;  %p667_p7 = scmp.lt.u32.totalorder %s901_s14, %s1013_s0 }
  0x34   : > { %p664_p3 = pnand %p663_p0, %p662_p13  ;;  %p668_p9 = scmp.lt.u32.totalorder %s666_s27, %s661_s16 }
  0x35   : > { %p670_p1 = scmp.lt.u32.totalorder %s661_s16, %s901_s14 }
  0x36   : > { %p665_p5 = pneg %p664_p3  ;;  %p669_p2 = por %p668_p9, %p667_p7 }
  0x38   : > { %p671_p4 = por %p670_p1, %p669_p2 }
  0x3a   : > { %p672_p6 = pnand %p671_p4, %p665_p5 }
  0x3c   : > { %675 = shalt.err (!%p672_p6)
}
  0x3d   : > { %s676_s10 = scalar_lea.vmem %s907_s6, 128  ;;  %s766_s29 = smov [#allocation2]  }
  0x3e   : > { %p677_p8 = scmp.ne.s32.totalorder %s907_s6, %s676_s10  ;;  %s681_s13 = sshll.u32 %s766_s29, 4  ;;  %s682_s13 = int_to_ptr.vmem [resolvable:$false] %s681_s13 }
  0x3f   : > { %s683_s28 = scalar_lea.vmem %s682_s13, 256  ;;  %p684_p3 = scmp.lt.s32.totalorder %s907_s6, %s682_s13 }
  0x40   : > { %p679_p10 = pnand %p677_p8, %p663_p0  ;;  %p685_p7 = scmp.lt.s32.totalorder %s683_s28, %s676_s10 }
  0x42   : > { %p680_p13 = pneg %p679_p10  ;;  %p686_p9 = por %p685_p7, %p684_p3 }
  0x44   : > { %p687_p2 = pnand %p686_p9, %p680_p13 }
  0x46   : > { %690 = shalt.err (!%p687_p2)
}
  0x47   : > { %584 = dma.hbm_to_vmem [thread:$0]  (!%p903_p11), %s901_s14, 128, %s907_s6, %s199_s15  }
  0x48   : > { %p1029_p5 = scmp.ne.s32.totalorder %s1024_s26, 0 }
  0x49   : > { %s937_s16 = sand.u32 (!%p1029_p5), 1, %s753_s19   ;;  %p1030_p0 = scmp.ne.s32.totalorder (!%p1029_p5), %s1022_s24, 0 }
  0x4a   : > { %218 = sbr.rel (%p1029_p5) target bundleno = 520 (0x208), region = 40  ;;  %s483_s17 = sshll.u32 (!%p1029_p5), %s937_s16, 3 }
  0x4b   : > { %s221_s23 = scalar_lea.sflag (!%p1029_p5), [#allocation3], %s937_s16  ;;  %s943_s27 = scalar_lea.vmem (!%p1029_p5), [#allocation2], %s483_s17 }
  0x51   : > { %736 = dma.done.wait (%p1030_p0), %s221_s23, 128  }
  0x52   : > { %738 = vsyncadd (%p1030_p0), %s221_s23, 4294967168  ;;  %p1031_p11 = scmp.eq.s32.totalorder %s822_s22, 0 }
  0x54   : > { %740 = dma.done.wait (%p1031_p11), [#allocation6], 2048   ;;  %p1032_p1 = pmov %p1031_p11 }
  0x55   : > { %v767_v0 = vmov 0.0|0.0   ;;  %vm768_vm0 = vmmov 0   ;;  %v769_v1 = vmov 0.0   ;;  %v256_v2 = vld [vmem:[#allocation5] sm:$0xff]  ;;  %v257_v3 = vld [vmem:[#allocation5 + $0x8] sm:$0xff]  ;;  %v258_v4 = vld [vmem:[#allocation5 + $0x10] sm:$0xff] }
  0x56   : > { %742 = vsyncadd (%p1032_p1), [#allocation6], 4294965248  ;;  %545 = vmatprep.subr.bf16.mxu0 %v767_v0  ;;  %542 = vmatprep.mubr.msk.f32.mxu0 %vm768_vm0, %v769_v1  ;;  %v546_v5 = vpack.c.bf16 %v257_v3, %v256_v2  ;;  %v259_v6 = vld [vmem:[#allocation5 + $0x18] sm:$0xff]  ;;  %v260_v8 = vld [vmem:[#allocation5 + $0x20] sm:$0xff]  ;;  %s490_s11 = sshll.u32 %s822_s22, 7  ;;  %s254_s12 = scalar_lea.vmem [#allocation7], %s483_s17 }
  0x57   : > { %v549_v7 = vpack.c.bf16 %v259_v6, %v258_v4  ;;  %v261_v9 = vld [vmem:[#allocation5 + $0x28] sm:$0xff]  ;;  %v262_v11 = vld [vmem:[#allocation5 + $0x30] sm:$0xff]  ;;  %v263_v12 = vld [vmem:[#allocation5 + $0x38] sm:$0xff]  ;;  %s396_s10 = sshll.u32 %s254_s12, 4  ;;  %s969_s28 = scalar_lea.hbm %s1018_s5, %s490_s11  ;;  %s971_s10 = int_to_ptr.vmem [resolvable:$true] %s396_s10 }
  0x58   : > { %547 = vmatpush3.bf16.msra.mxu0 %v546_v5  ;;  %v552_v10 = vpack.c.bf16 %v261_v9, %v260_v8  ;;  %v555_v13 = vpack.c.bf16 %v263_v12, %v262_v11  ;;  %v264_v14 = vld [vmem:[#allocation5 + $0x40] sm:$0xff]  ;;  %v265_v15 = vld [vmem:[#allocation5 + $0x48] sm:$0xff]  ;;  %v266_v17 = vld [vmem:[#allocation5 + $0x50] sm:$0xff]  ;;  %s383_s23 = scalar_lea.sflag [#allocation4], %s937_s16  ;;  %s770_s22 = smov [#allocation7]  }
  0x59   : > { %548 = vmatprep.subr.bf16.mxu0 %v767_v0  ;;  %v558_v16 = vpack.c.bf16 %v265_v15, %v264_v14  ;;  %v267_v18 = vld [vmem:[#allocation5 + $0x58] sm:$0xff]  ;;  %v268_v20 = vld [vmem:[#allocation5 + $0x60] sm:$0xff]  ;;  %v269_v21 = vld [vmem:[#allocation5 + $0x68] sm:$0xff]  ;;  %s695_s17 = sshll.u32 %s770_s22, 4  ;;  %s696_s17 = int_to_ptr.vmem [resolvable:$false] %s695_s17 }
  0x5a   : > { %v561_v19 = vpack.c.bf16 %v267_v18, %v266_v17  ;;  %v564_v22 = vpack.c.bf16 %v269_v21, %v268_v20  ;;  %v270_v23 = vld [vmem:[#allocation5 + $0x70] sm:$0xff]  ;;  %v271_v24 = vld [vmem:[#allocation5 + $0x78] sm:$0xff]  ;;  %s697_s24 = scalar_lea.vmem %s696_s17, 256  ;;  %p698_p10 = scmp.lt.s32.totalorder %s971_s10, %s696_s17 }
  0x5b   : > { %v567_v25 = vpack.c.bf16 %v271_v24, %v270_v23  ;;  %v255_v26 = vld [vmem:[%s943_s27] sm:$0xff]  ;;  %s691_s27 = scalar_lea.vmem %s971_s10, 128 }
  0x5c   : > { %550 = vmatpush3.bf16.msra.mxu0 %v549_v7  ;;  %v486_v27 = vld [vmem:[%s1015_s2] ss:$0 sm:$0xff]  ;;  %p692_p4 = scmp.ne.s32.totalorder %s971_s10, %s691_s27  ;;  %p699_p13 = scmp.lt.s32.totalorder %s697_s24, %s691_s27 }
  0x5d   : > { %551 = vmatprep.subr.bf16.mxu0 %v767_v0  ;;  %v487_v43 = vld [vmem:[%s1016_s3] ss:$0 sm:$0xff] }
  0x5e   : > { %v488_v45 = vld [vmem:[%s1017_s4] ss:$0 sm:$0xff]  ;;  %p693_p6 = pnand %p692_p4, %p892_p12  ;;  %p700_p3 = por %p699_p13, %p698_p10 }
  0x60   : > { %553 = vmatpush3.bf16.msra.mxu0 %v552_v10  ;;  %p694_p8 = pneg %p693_p6 }
  0x61   : > { %554 = vmatprep.subr.bf16.mxu0 %v767_v0 }
  0x62   : > { %p701_p7 = pnand %p700_p3, %p694_p8 }
  0x64   : > { %556 = vmatpush3.bf16.msra.mxu0 %v555_v13 }
  0x65   : > { %557 = vmatprep.subr.bf16.mxu0 %v767_v0 }
  0x68   : > { %559 = vmatpush3.bf16.msra.mxu0 %v558_v16 }
  0x69   : > { %560 = vmatprep.subr.bf16.mxu0 %v767_v0 }
  0x6c   : > { %562 = vmatpush3.bf16.msra.mxu0 %v561_v19 }
  0x6d   : > { %563 = vmatprep.subr.bf16.mxu0 %v767_v0 }
  0x70   : > { %565 = vmatpush3.bf16.msra.mxu0 %v564_v22 }
  0x71   : > { %566 = vmatprep.subr.bf16.mxu0 %v767_v0 }
  0x74   : > { %568 = vmatpush3.bf16.msra.mxu0 %v567_v25 }
  0x77   : > { %543 = vmatmul.mubr.f32.vlgmr.msra.gmra.mrb[0].mxu0 %v255_v26 }
 0x14a   : > { %v345_v28 = vpop.f32.mrb[0].mxu0 }
 0x14b   : > { %v346_v29 = vadd.f32 %v486_v27, %v345_v28  ;;  %v544_v30 = vpop.f32.mrb[1].mxu0 }
 0x14d   : > { %v349_v31 = vadd.f32 %v346_v29, %v255_v26 }
 0x14f   : > { %350 = vadd.xlane.f32.xlu0 %v349_v31  ;;  %v354_v32 = vmul.f32 %v349_v31, %v349_v31 }
 0x153   : > { %355 = vadd.xlane.f32.xlu0 %v354_v32 }
 0x1dc   : > { %v351_v33 = vpop.xlane.xlu0 %350 }
 0x1dd   : > { %v353_v34 = vmul.f32 0.0078125, %v351_v33 }
 0x1df   : > { %v358_v36 = vmul.f32 %v353_v34, %v353_v34  ;;  %v363_v41 = vsub.f32 %v349_v31, %v353_v34 }
 0x1e0   : > { %v356_v35 = vpop.xlane.xlu0 %355 }
 0x1e1   : > { %v357_v37 = vmul.f32 0.0078125, %v356_v35 }
 0x1e3   : > { %v359_v38 = vsub.f32 %v357_v37, %v358_v36 }
 0x1e5   : > { %v360_v39 = vmax.f32 %v359_v38, 0.0 }
 0x1e7   : > { %v361_v40 = vadd.f32 1e-05, %v360_v39 }
 0x1e9   : > { %631 = vrsqrt.f32 %v361_v40 }
 0x1f3   : > { %v632_v42 = vpop.eup %631 }
 0x1f4   : > { %v364_v44 = vmul.f32 %v632_v42, %v363_v41 }
 0x1f6   : > { %v372_v46 = vmul.f32 %v487_v43, %v364_v44 }
 0x1f8   : > { %v380_v47 = vadd.f32 %v488_v45, %v372_v46 }
 0x1fa   : > { %381 = vst [vmem:[%s254_s12] sm:$0xff] %v380_v47 }
 0x1fb   : > { %704 = shalt.err (!%p701_p7)
}
 0x1fc   : > { %s705_s16 = scalar_lea.hbm %s969_s28, 128  ;;  %s709_s6 = scalar_lea.hbm %s1018_s5, 256 }
 0x1fd   : > { %p706_p9 = scmp.ne.s32.totalorder %s969_s28, %s705_s16  ;;  %p710_p0 = scmp.lt.u32.totalorder %s969_s28, %s1018_s5 }
 0x1fe   : > { %p711_p11 = scmp.lt.u32.totalorder %s709_s6, %s705_s16  ;;  %p713_p4 = scmp.lt.u32.totalorder %s705_s16, %s969_s28 }
 0x1ff   : > { %p707_p2 = pnand %p706_p9, %p892_p12 }
 0x200   : > { %p712_p1 = por %p711_p11, %p710_p0 }
 0x201   : > { %p708_p5 = pneg %p707_p2 }
 0x202   : > { %p714_p6 = por %p713_p4, %p712_p1 }
 0x204   : > { %p715_p8 = pnand %p714_p6, %p708_p5 }
 0x206   : > { %718 = shalt.err (!%p715_p8)
}
 0x207   : > { %575 = dma.vmem_to_hbm [thread:$0]  (%p892_p12), %s971_s10, 128, %s969_s28, %s383_s23  }
 0x208 PF: > { %s408_s11 = sand.u32 1, %s749_s18   ;;  %p1033_p10 = scmp.ne.s32.totalorder %s1023_s25, 0 }
 0x209   : > { %p1034_p13 = scmp.ge.s32.totalorder %s761_s21, 2  ;;  %s409_s12 = scalar_lea.sflag [#allocation4], %s408_s11 }
 0x20b   : > { %p586_p3 = pnand %p1034_p13, %p1033_p10 }
 0x20d   : > { %744 = dma.done.wait (!%p586_p3), %s409_s12, 128  }
 0x20e   : > { %746 = vsyncadd (!%p586_p3), %s409_s12, 4294967168  ;;  %p19_p7 = scmp.ge.s32.totalorder %s857_s30, 4   ;;  %s1035_s18 = smov %s753_s19 }
 0x20f   : > { %s1036_s19 = smov %s757_s20  ;;  %s1037_s20 = smov %s888_s8 }
 0x210   : > { %s1038_s21 = smov %s857_s30  ;;  %21 = sbr.rel (!%p19_p7) target bundleno = 6 (0x6), region = 89 }
 0x217   :  { %414 = vsyncpa [#allocation3], 1 }
 0x218   :  { %416 = vsyncpa [#allocation3 + $0x1], 1 }
 0x219   :  { %417 = vsyncpa [#allocation6], 1 }
 0x21a   :  { %418 = vsyncpa [#allocation4], 1 }
 0x21b   :  { %420 = vsyncpa [#allocation4 + $0x1], 1 }

</bundles_post_ra>
